<compile_context>
chip_gen: v7x
topology: tpu7x:2x2x1
jax: 0.10.0
libtpu: 0.0.40
codegen_flags: <defaults>
</compile_context>

<pallas_src>
import math
from functools import partial

import jax
import jax.numpy as jnp
from jax.experimental import pallas as pl
from jax.experimental.pallas import tpu as pltpu

# ----------------------------- model hyper-params (module defaults) ----------
IN_CHANNELS = 3
CONV_SCALE_NUM = 4
CONV_SCALE_STRIDES = [8, 6, 4, 2]
CONV_CHANNELS = [16, 48, 96, 96]          # last = d_model // patch_size
CONV_KERNELS = [16, 8, 6, 1]
CONV_STRIDES = [2, 2, 2, 1]
D_MODEL = 768
PATCH = 8
N_HEAD = 12
HEAD_DIM = D_MODEL // N_HEAD
LLM_LAYERS = 3
MLP_INNER = 4 * D_MODEL
N_CTX = 64
FEAT = CONV_CHANNELS[-1]                  # 96

VMEM_LIMIT = 32 * 1024 * 1024             # fits scoped budgets on v5e/v6e/v7x
MM_VMEM_BUDGET = 18 * 1024 * 1024         # double-buffered working-set budget


def _rup(x, m):
    return ((x + m - 1) // m) * m


def _apply_act(y, act):
    if act in ("gelu", "gelu_tanh"):
        return jax.nn.gelu(y, approximate=True)
    return y


# ----------------------------- Pallas matmul (+LN, +bias, +act) ---------------
def _make_mm_kernel(act, has_bias, has_ln, eps):
    def kernel(*refs):
        i = 0
        a_ref = refs[i]; i += 1
        b_ref = refs[i]; i += 1
        if has_ln:
            g_ref = refs[i]; i += 1
            be_ref = refs[i]; i += 1
        if has_bias:
            bias_ref = refs[i]; i += 1
        o_ref = refs[i]

        a = a_ref[...]
        if has_ln:
            a = a.astype(jnp.float32)
            mu = jnp.mean(a, axis=-1, keepdims=True)
            var = jnp.mean(jnp.square(a - mu), axis=-1, keepdims=True)
            a = (a - mu) * jax.lax.rsqrt(var + eps) * g_ref[...] + be_ref[...]
        y = jnp.dot(a.astype(jnp.bfloat16), b_ref[...],
                    preferred_element_type=jnp.float32)
        if has_bias:
            y = y + bias_ref[...]
        o_ref[...] = _apply_act(y, act).astype(o_ref.dtype)
    return kernel


def _pick_tn(tm, kp, np_, a_bytes, out_bytes, budget=MM_VMEM_BUDGET):
    """Largest N-tile dividing N (multiple of 128) whose double-buffered working
    set fits the budget; non-128-aligned N stays a single full-dim tile."""
    if np_ % 128 != 0:
        return np_
    ndiv = np_ // 128
    for d in range(1, ndiv + 1):
        if ndiv % d:
            continue
        tn = np_ // d
        need = 2 * (tm * kp * a_bytes + kp * tn * 2 + tm * tn * out_bytes) \
            + 8 * (np_ + kp)
        if need <= budget:
            return tn
    return 128


def pl_matmul(a, b, bias=None, act=None, out_dtype=jnp.float32,
              ln=None, bias_rows=False, ln_eps=1e-5):
    """(M,K)@(K,N): bf16 operands on the MXU, f32 accumulation.
    Optional fused LayerNorm on `a` rows, fused bias (per-col or per-row) and GELU.
    Single full-M / full-K tile; N tiled by the largest VMEM-fitting tile."""
    M, K = a.shape
    K2, N = b.shape
    assert K == K2
    assert M <= 512, "model shapes keep M small (single M tile)"
    has_ln = ln is not None
    has_bias = bias is not None
    assert not has_ln or K % 8 == 0      # no K padding under fused LN

    a = a.astype(jnp.float32 if has_ln else jnp.bfloat16)
    b = b.astype(jnp.bfloat16)

    # pad K to a multiple of 8 (zero contraction rows -> no effect on the result)
    Kp = _rup(K, 8)
    if Kp != K:
        a = jnp.pad(a, ((0, 0), (0, Kp - K)))
        b = jnp.pad(b, ((0, Kp - K), (0, 0)))

    tm = M
    a_bytes = 4 if has_ln else 2
    out_bytes = jnp.dtype(out_dtype).itemsize
    tn = _pick_tn(tm, Kp, N, a_bytes, out_bytes)

    in_specs = [pl.BlockSpec((tm, Kp), lambda j: (0, 0)),
                pl.BlockSpec((Kp, tn), lambda j: (0, j))]
    args = [a, b]
    if has_ln:
        g, be = ln
        g = g.astype(jnp.float32).reshape(1, Kp)
        be = be.astype(jnp.float32).reshape(1, Kp)
        in_specs += [pl.BlockSpec((1, Kp), lambda j: (0, 0)),
                     pl.BlockSpec((1, Kp), lambda j: (0, 0))]
        args += [g, be]
    if has_bias:
        bias = bias.astype(jnp.float32)
        if bias_rows:
            args.append(bias.reshape(M, 1))
            in_specs.append(pl.BlockSpec((tm, 1), lambda j: (0, 0)))
        else:
            args.append(bias.reshape(1, N))
            in_specs.append(pl.BlockSpec((1, tn), lambda j: (0, j)))

    return pl.pallas_call(
        _make_mm_kernel(act, has_bias, has_ln, ln_eps),
        out_shape=jax.ShapeDtypeStruct((M, N), out_dtype),
        grid=(N // tn,),
        in_specs=in_specs,
        out_specs=pl.BlockSpec((tm, tn), lambda j: (0, j)),
        compiler_params=pltpu.CompilerParams(
            dimension_semantics=("parallel",),
            vmem_limit_bytes=VMEM_LIMIT),
    )(*args)


# ----------------------------- ScaledActivation (spec class) ------------------
def _scaled_act_kernel(x_ref, o_ref, *, act, scale):
    o_ref[...] = (_apply_act(x_ref[...].astype(jnp.float32), act)
                  * scale).astype(o_ref.dtype)


def scaled_activation(x, act="gelu_tanh", scale_factor=1.0):
    """Pallas kernel for ScaledActivation.forward: act(x) * scale_factor (2-D x)."""
    R, C = x.shape
    rt = 8 if (R % 8 == 0 and R > 8) else R
    return pl.pallas_call(
        partial(_scaled_act_kernel, act=act, scale=scale_factor),
        out_shape=jax.ShapeDtypeStruct((R, C), jnp.float32),
        grid=(R // rt,),
        in_specs=[pl.BlockSpec((rt, C), lambda i: (i, 0))],
        out_specs=pl.BlockSpec((rt, C), lambda i: (i, 0)),
        compiler_params=pltpu.CompilerParams(dimension_semantics=("parallel",)),
    )(x.astype(jnp.float32))


# ----------------------------- Pallas causal attention (fused heads) ----------
def _attn_kernel(qkv_ref, o_ref, *, scale, n_head, head_dim, d_model):
    T = qkv_ref.shape[1]
    row = jax.lax.broadcasted_iota(jnp.int32, (T, T), 0)
    col = jax.lax.broadcasted_iota(jnp.int32, (T, T), 1)
    causal = row >= col
    for h in range(n_head):
        lo = h * head_dim
        q = qkv_ref[0, :, lo:lo + head_dim]                          # (T,Dh) bf16
        k = qkv_ref[0, :, d_model + lo:d_model + lo + head_dim]
        v = qkv_ref[0, :, 2 * d_model + lo:2 * d_model + lo + head_dim]
        s = jax.lax.dot_general(q, k, (((1,), (1,)), ((), ())),
                                preferred_element_type=jnp.float32) * scale
        s = jnp.where(causal, s, -1e30)
        s = s - jnp.max(s, axis=-1, keepdims=True)
        p = jnp.exp(s)
        p = p * pl.reciprocal(jnp.sum(p, axis=-1, keepdims=True), approx=True)
        o = jnp.dot(p.astype(jnp.bfloat16), v,
                    preferred_element_type=jnp.float32)
        # lane-dense head concat: write each head into its 64-lane slot of (T, D)
        o_ref[0, :, lo:lo + head_dim] = o.astype(o_ref.dtype)


def pl_causal_attention(qkv):
    """qkv: (B, T, 3*D) bf16 straight from the qkv matmul; returns (B, T, D) bf16."""
    B, T, threeD = qkv.shape
    D = threeD // 3
    return pl.pallas_call(
        partial(_attn_kernel, scale=1.0 / math.sqrt(HEAD_DIM),
                n_head=N_HEAD, head_dim=HEAD_DIM, d_model=D),
        out_shape=jax.ShapeDtypeStruct((B, T, D), jnp.bfloat16),
        grid=(B,),
        in_specs=[pl.BlockSpec((1, T, threeD), lambda b: (b, 0, 0))],
        out_specs=pl.BlockSpec((1, T, D), lambda b: (b, 0, 0)),
        compiler_params=pltpu.CompilerParams(
            dimension_semantics=("parallel",), vmem_limit_bytes=VMEM_LIMIT),
    )(qkv.astype(jnp.bfloat16))


# ----------------------------- Pallas LayerNorm (standalone, for ln_f) --------
def _layernorm_kernel(x_ref, g_ref, b_ref, o_ref, *, eps):
    x = x_ref[...].astype(jnp.float32)
    mu = jnp.mean(x, axis=-1, keepdims=True)
    var = jnp.mean(jnp.square(x - mu), axis=-1, keepdims=True)
    o_ref[...] = (x - mu) * jax.lax.rsqrt(var + eps) * g_ref[...] + b_ref[...]


def layer_norm(x, gamma, beta, eps=1e-5):
    R, D = x.shape
    rt = 16 if R % 16 == 0 else R          # row grid -> both TCs busy on v7x
    return pl.pallas_call(
        partial(_layernorm_kernel, eps=eps),
        out_shape=jax.ShapeDtypeStruct((R, D), jnp.float32),
        grid=(R // rt,),
        in_specs=[pl.BlockSpec((rt, D), lambda i: (i, 0)),
                  pl.BlockSpec((1, D), lambda i: (0, 0)),
                  pl.BlockSpec((1, D), lambda i: (0, 0))],
        out_specs=pl.BlockSpec((rt, D), lambda i: (i, 0)),
        compiler_params=pltpu.CompilerParams(dimension_semantics=("parallel",)),
    )(x.astype(jnp.float32), gamma.reshape(1, D).astype(jnp.float32),
      beta.reshape(1, D).astype(jnp.float32))


# ----------------------------- Pallas BatchNorm1d (+GELU), (C,N,L) layout -----
def _bn_act_kernel(x_ref, g_ref, b_ref, o_ref, *, apply_gelu, eps):
    x = x_ref[...].astype(jnp.float32)                        # (Ct, N, L)
    mean = jnp.mean(jnp.mean(x, axis=2, keepdims=True), axis=1, keepdims=True)
    d = x - mean
    var = jnp.mean(jnp.mean(d * d, axis=2, keepdims=True), axis=1, keepdims=True)
    y = d * jax.lax.rsqrt(var + eps) * g_ref[...] + b_ref[...]
    if apply_gelu:
        y = jax.nn.gelu(y, approximate=True)
    o_ref[...] = y.astype(o_ref.dtype)


def bn_act(x_cnl, gamma, beta, gelu, eps=1e-5, out_dtype=jnp.bfloat16):
    """Training-mode BatchNorm1d over (N, L) per channel; x: (C, N, L).
    Channel-tiled grid so both v7x TensorCores get work; f32 stats in-kernel."""
    C, N, L = x_cnl.shape
    ct = C // 2 if (C % 2 == 0 and (C // 2) % 8 == 0) else C
    return pl.pallas_call(
        partial(_bn_act_kernel, apply_gelu=gelu, eps=eps),
        out_shape=jax.ShapeDtypeStruct((C, N, L), out_dtype),
        grid=(C // ct,),
        in_specs=[pl.BlockSpec((ct, N, L), lambda i: (i, 0, 0)),
                  pl.BlockSpec((ct, 1, 1), lambda i: (i, 0, 0)),
                  pl.BlockSpec((ct, 1, 1), lambda i: (i, 0, 0))],
        out_specs=pl.BlockSpec((ct, N, L), lambda i: (i, 0, 0)),
        compiler_params=pltpu.CompilerParams(dimension_semantics=("parallel",)),
    )(x_cnl, gamma.reshape(C, 1, 1).astype(jnp.float32),
      beta.reshape(C, 1, 1).astype(jnp.float32))


# ----------------------------- Conv1d = strided-slice im2col + matmul ---------
def conv1d_cm(x, w, bias, stride, pad_same=False, act=None, out_dtype=jnp.bfloat16):
    """Channel-major conv: x (Cin, N, L), w (Cout, Cin, K) -> (Cout, N, L_out).
    Operand-swapped matmul so the 128-aligned N*L_out axis is the lane axis."""
    Cin, N, L = x.shape
    Cout, Cin2, K = w.shape
    assert Cin == Cin2
    if pad_same:                                      # _auto_pad_1d semantics
        pds = (stride - L % stride) % stride + K - stride
        assert pds >= 0, "auto-pad formula invalid for K < stride"
        left = pds // 2
        x = jnp.pad(x, ((0, 0), (0, 0), (left, pds - left)))
        L = L + pds
    L_out = (L - K) // stride + 1
    xb = x.astype(jnp.bfloat16)

    if K == 1 and stride == 1:                        # 1x1 projection fast path
        patches = xb.reshape(Cin, N * L_out)
    else:
        span = (L_out - 1) * stride + 1
        cols = [xb[:, :, kk:kk + span:stride] for kk in range(K)]  # (Cin,N,L_out)
        patches = jnp.stack(cols, axis=1).reshape(Cin * K, N * L_out)

    w2 = w.reshape(Cout, Cin * K)
    y = pl_matmul(w2, patches, bias=bias, bias_rows=True, act=act,
                  out_dtype=out_dtype)                # (Cout, N*L_out), lane-dense
    return y.reshape(Cout, N, L_out)


# ----------------------------- model blocks -----------------------------------
def multi_scale_block(x, blk, stride):
    inc = x.shape[0]
    # fused 1x1 in_proj for all 4 scales (single matmul instead of 4)
    xi_all = conv1d_cm(x, blk["in_proj_w"], None, stride=1)       # (4*inc, N, L)
    outs = []
    for s, cb in enumerate(blk["convs"]):
        xi = xi_all[s * inc:(s + 1) * inc]
        xi = conv1d_cm(xi, cb["conv_w"], None, stride=stride, pad_same=True)
        xi = bn_act(xi, cb["bn_g"], cb["bn_b"], gelu=True)
        outs.append(xi)
    x = jnp.concatenate(outs, axis=0)
    x = conv1d_cm(x, blk["out_proj_w"], None, stride=1)
    x = bn_act(x, blk["bn_g"], blk["bn_b"], gelu=False)
    return x


def gpt2_forward(tok, p):
    """tok: (B, T, D). GPT2Model(inputs_embeds=tok) with first LLM_LAYERS blocks."""
    B, T, D = tok.shape
    h = tok.astype(jnp.float32) + p["wpe"][:T][None]
    for lp in p["layers"]:
        h2 = h.reshape(B * T, D)
        # LayerNorm fused into the qkv matmul; bf16 lane-dense qkv output
        qkv = pl_matmul(h2, lp["attn_w"], bias=lp["attn_b"],
                        ln=(lp["ln1_g"], lp["ln1_b"]),
                        out_dtype=jnp.bfloat16).reshape(B, T, 3 * D)
        o = pl_causal_attention(qkv)                               # (B,T,D) bf16
        o = pl_matmul(o.reshape(B * T, D), lp["attn_proj_w"],
                      bias=lp["attn_proj_b"]).reshape(B, T, D)
        h = h + o

        # LayerNorm fused into the fc matmul; gelu_new (tanh) fused; bf16 out
        m = pl_matmul(h.reshape(B * T, D), lp["fc_w"], bias=lp["fc_b"],
                      act="gelu_tanh", ln=(lp["ln2_g"], lp["ln2_b"]),
                      out_dtype=jnp.bfloat16)
        m = pl_matmul(m, lp["mlp_proj_w"], bias=lp["mlp_proj_b"]).reshape(B, T, D)
        h = h + m
    h = layer_norm(h.reshape(B * T, D), p["lnf_g"], p["lnf_b"]).reshape(B, T, D)
    return h


def _head_linear_kernel(x_ref, w_ref, b_ref, o_ref):
    x = x_ref[...].astype(jnp.float32)                 # (N, C)
    w = w_ref[...].astype(jnp.float32)                 # (1, C)
    o_ref[...] = jnp.sum(x * w, axis=-1, keepdims=True) + b_ref[...]


def head_linear(feat, w, bias):
    Nb, C = feat.shape
    return pl.pallas_call(
        _head_linear_kernel,
        out_shape=jax.ShapeDtypeStruct((Nb, 1), jnp.float32),
        grid=(1,),
        in_specs=[pl.BlockSpec((Nb, C), lambda i: (0, 0)),
                  pl.BlockSpec((1, C), lambda i: (0, 0)),
                  pl.BlockSpec((1, 1), lambda i: (0, 0))],
        out_specs=pl.BlockSpec((Nb, 1), lambda i: (0, 0)),
    )(feat.astype(jnp.float32), w.reshape(1, C).astype(jnp.float32),
      bias.reshape(1, 1).astype(jnp.float32))


def forward(params, x):
    """x: (N, 3, L) float32; returns (N, 1)."""
    # channel-major layout for the whole conv stack (lane axis = N*L)
    h = jnp.transpose(x, (1, 0, 2)).astype(jnp.bfloat16)          # (C, N, L)
    for b, blk in enumerate(params["conv_blocks"]):
        h = multi_scale_block(h, blk, CONV_STRIDES[b])

    # --- LLM block: unfold into patches -> GPT2 -> fold back ---
    C, N, L = h.shape
    T = L // PATCH
    h = h[:, :, :T * PATCH]
    tok = h.reshape(C, N, T, PATCH).transpose(1, 2, 0, 3).reshape(N, T, C * PATCH)
    tok = gpt2_forward(tok, params["llm"])                        # (N, T, D) f32
    h = tok.reshape(N, T, C, PATCH).transpose(2, 0, 1, 3).reshape(C, N, T * PATCH)

    # --- HeadRegression ---
    hp = params["head"]
    h = conv1d_cm(h, hp["conv1_w"], hp["conv1_b"], stride=4, out_dtype=jnp.float32)
    h = conv1d_cm(h, hp["conv2_w"], hp["conv2_b"], stride=4, out_dtype=jnp.float32)
    h = jnp.mean(h, axis=-1)                          # (C, N): AdaptiveAvgPool1d(1)
    out = head_linear(h.T, hp["lin_w"], hp["lin_b"])  # Linear(feat, 1) -> (N, 1)
    return out


# ----------------------------- deterministic parameter init -------------------
def init_params(key):
    keys = iter(jax.random.split(key, 256))
    bf = jnp.bfloat16

    def nrm(shape, scale=0.02, dtype=jnp.float32):
        return (jax.random.normal(next(keys), shape, dtype=jnp.float32) * scale).astype(dtype)

    ones = lambda n: jnp.ones((n,), jnp.float32)
    zeros = lambda n: jnp.zeros((n,), jnp.float32)

    blocks = []
    in_dims = [IN_CHANNELS] + CONV_CHANNELS[:-1]
    for b in range(len(CONV_CHANNELS)):
        inc, outc = in_dims[b], CONV_CHANNELS[b]
        ss, base_k = CONV_SCALE_STRIDES[b], CONV_KERNELS[b]
        convs = []
        for s in range(CONV_SCALE_NUM):
            k = base_k + ss * s
            convs.append(dict(
                conv_w=nrm((outc, inc, k), dtype=bf),
                bn_g=ones(outc), bn_b=zeros(outc),
            ))
        blocks.append(dict(
            in_proj_w=nrm((CONV_SCALE_NUM * inc, inc, 1), dtype=bf),
            convs=convs,
            out_proj_w=nrm((outc, CONV_SCALE_NUM * outc, 1), dtype=bf),
            bn_g=ones(outc), bn_b=zeros(outc),
        ))

    layers = []
    for _ in range(LLM_LAYERS):
        layers.append(dict(
            ln1_g=ones(D_MODEL), ln1_b=zeros(D_MODEL),
            attn_w=nrm((D_MODEL, 3 * D_MODEL), dtype=bf), attn_b=zeros(3 * D_MODEL),
            attn_proj_w=nrm((D_MODEL, D_MODEL), dtype=bf), attn_proj_b=zeros(D_MODEL),
            ln2_g=ones(D_MODEL), ln2_b=zeros(D_MODEL),
            fc_w=nrm((D_MODEL, MLP_INNER), dtype=bf), fc_b=zeros(MLP_INNER),
            mlp_proj_w=nrm((MLP_INNER, D_MODEL), dtype=bf), mlp_proj_b=zeros(D_MODEL),
        ))
    llm = dict(wpe=nrm((N_CTX, D_MODEL)), layers=layers,
               lnf_g=ones(D_MODEL), lnf_b=zeros(D_MODEL))

    head = dict(
        conv1_w=nrm((FEAT, FEAT, 16), dtype=bf), conv1_b=zeros(FEAT),
        conv2_w=nrm((FEAT, FEAT, 16), dtype=bf), conv2_b=zeros(FEAT),
        lin_w=nrm((1, FEAT), dtype=bf), lin_b=zeros(1),
    )
    return dict(conv_blocks=blocks, llm=llm, head=head)


# ----------------------------- main -------------------------------------------
if __name__ == "__main__":
    key = jax.random.PRNGKey(0)
    pkey, xkey, akey = jax.random.split(key, 3)
    params = init_params(pkey)

    # spec class on its own: ScaledActivation(nn.GELU, 0.5).forward
    sa_in = jax.random.normal(akey, (16, 256), dtype=jnp.float32)
    sa_out = jax.block_until_ready(
        scaled_activation(sa_in, act="gelu_tanh", scale_factor=0.5))
    assert sa_out.shape == (16, 256)
    assert bool(jnp.all(jnp.isfinite(sa_out)))

    # small waveform: batch=2, 3 channels, length 1024
    # (4 conv stages of stride 2,2,2,1 -> L=128 -> 16 patches of 8 -> 16 GPT2 tokens)
    x = jax.random.normal(xkey, (2, IN_CHANNELS, 1024), dtype=jnp.float32)

    fwd = jax.jit(forward)
    out = jax.block_until_ready(fwd(params, x))
    assert out.shape == (2, 1)
    assert bool(jnp.all(jnp.isfinite(out)))
    print("KERNEL_OK")
</pallas_src>

<mosaic_0001>
module attributes {stable_mosaic.version = 11 : i64} {
  func.func @_scaled_act_kernel(%arg0: i32, %arg1: memref<8x256xf32, #tpu.memory_space<vmem>>, %arg2: memref<8x256xf32, #tpu.memory_space<vmem>>) attributes {dimension_semantics = [#tpu.dimension_semantics<parallel>], iteration_bounds = array<i64: 2>, scalar_prefetch = 0 : i64, scratch_operands = 0 : i64, tpu.core_type = #tpu.core_type<tc>, window_params = [{transform_indices = @transform_0, window_bounds = array<i64: 8, 256>}, {transform_indices = @transform_1, window_bounds = array<i64: 8, 256>}]} {
    %c0 = arith.constant 0 : index
    %c0_0 = arith.constant 0 : index
    %0 = vector.load %arg1[%c0, %c0_0] : memref<8x256xf32, #tpu.memory_space<vmem>>, vector<8x256xf32>
    %1 = arith.mulf %0, %0 : vector<8x256xf32>
    %2 = arith.mulf %0, %1 : vector<8x256xf32>
    %cst = arith.constant 4.471500e-02 : f32
    %3 = vector.broadcast %cst : f32 to vector<8x256xf32>
    %4 = arith.mulf %3, %2 : vector<8x256xf32>
    %5 = arith.addf %0, %4 : vector<8x256xf32>
    %cst_1 = arith.constant 0.797884583 : f32
    %6 = vector.broadcast %cst_1 : f32 to vector<8x256xf32>
    %7 = arith.mulf %6, %5 : vector<8x256xf32>
    %8 = math.tanh %7 : vector<8x256xf32>
    %cst_2 = arith.constant 1.000000e+00 : f32
    %9 = vector.broadcast %cst_2 : f32 to vector<8x256xf32>
    %10 = arith.addf %9, %8 : vector<8x256xf32>
    %cst_3 = arith.constant 5.000000e-01 : f32
    %11 = vector.broadcast %cst_3 : f32 to vector<8x256xf32>
    %12 = arith.mulf %11, %10 : vector<8x256xf32>
    %13 = arith.mulf %0, %12 : vector<8x256xf32>
    %cst_4 = arith.constant 5.000000e-01 : f32
    %14 = vector.broadcast %cst_4 : f32 to vector<8x256xf32>
    %15 = arith.mulf %13, %14 : vector<8x256xf32>
    %c0_5 = arith.constant 0 : index
    %c0_6 = arith.constant 0 : index
    %16 = vector.load %arg2[%c0_5, %c0_6] : memref<8x256xf32, #tpu.memory_space<vmem>>, vector<8x256xf32>
    tpu.vector_store %arg2[%c0_5, %c0_6], %15 {strides = array<i32>} : memref<8x256xf32, #tpu.memory_space<vmem>>, vector<8x256xf32>,
    return
  }
  func.func @transform_0(%arg0: i32) -> (i32, i32) {
    %c0_i32 = arith.constant 0 : i32
    %c0_i32_0 = arith.constant 0 : i32
    return %arg0, %c0_i32 : i32, i32
  }
  func.func @transform_1(%arg0: i32) -> (i32, i32) {
    %c0_i32 = arith.constant 0 : i32
    %c0_i32_0 = arith.constant 0 : i32
    return %arg0, %c0_i32 : i32, i32
  }
}

</mosaic_0001>

<bundles_post_ra>
// kernel: tpu_custom_call.1
= control target key start
LH: loop header
LB: loop body
LE: loop exit
PB: predicated region body
PF: predicated region fallthrough
CT: control target
= control target key end

     0   :  { %6 = vsyncpa [#allocation3], 0  ;;  %s579_s0 = inlined_call_operand.hbm [shape: f32[16,256], index: 0, kind: input, shape index: {}]   ;;  %s580_s1 = inlined_call_operand.hbm [shape: f32[16,256], index: 1, kind: output, shape index: {}]  }
   0x1   :  { %8 = vsyncpa [#allocation3 + $0x1], 0 }
   0x2   :  { %9 = vsyncpa [#allocation4], 0 }
   0x3   :  { %11 = vsyncpa [#allocation4 + $0x1], 0  ;;  %s418_s6 = smov 0   ;;  %s420_s7 = smov 0  }
   0x4   :  { %s422_s8 = smov 0   ;;  %s424_s9 = smov 0  }
   0x5 LB: > { %s439_s10 = sadd.s32 4294967295, %s404_s9   ;;  %s242_s11 = sadd.s32 4294967294, %s404_s9   ;;  %s404_s9 = sphi %s424_s9, %s595_s9   ;;  %s400_s8 = sphi %s422_s8, %s594_s8   ;;  %s396_s7 = sphi %s420_s7, %s593_s7   ;;  %s392_s6 = sphi %s418_s6, %s592_s6  }
   0x6   : > { %s443_s12 = sadd.s32 1, %s404_s9   ;;  %s24_s13 = sadd.s32 1, %s400_s8 }
   0x7   : > { %s21_s14 = ssub.s32 %s404_s9, %s443_s12  ;;  %p31_p0 = scmp.ne.s32.totalorder %s400_s8, %s396_s7 }
   0x8   : > { %p22_p1 = scmp.eq.s32.totalorder %s21_s14, 0  ;;  %p32_p2 = scmp.eq.s32.totalorder %s404_s9, 0 }
   0x9   : > { %p37_p3 = scmp.ne.s32.totalorder %s396_s7, %s392_s6  ;;  %p38_p4 = scmp.eq.s32.totalorder %s439_s10, 0 }
   0xa   : > { %s455_s15 = scalar_select %p22_p1, %s400_s8, %s24_s13  }
   0xb   : > { %p457_p5 = por %p32_p2, %p31_p0  ;;  %p461_p6 = por %p38_p4, %p37_p3 }
   0xc   : > { %p61_p7 = scmp.eq.s32.totalorder %s439_s10, 1  ;;  %p67_p8 = scmp.eq.s32.totalorder %s242_s11, 1 }
   0xd   : > { %p270_p10 = scmp.lt.s32.totalorder %s404_s9, 2  ;;  %s87_s20 = sand.u32 1, %s400_s8  }
   0xe   : > { %p468_p11 = por %p61_p7, %p31_p0  ;;  %p472_p12 = por %p67_p8, %p37_p3 }
   0xf   : > { %s256_s21 = sshll.u32 %s404_s9, 8  ;;  %s245_s22 = sshll.u32 %s87_s20, 4 }
  0x10   : > { %s584_s18 = scalar_select %p468_p11, 1, 0 }
  0x11   : > { %s585_s19 = scalar_select %p472_p12, 1, 0 }
  0x12   : > { %s481_s25 = scalar_lea.hbm %s579_s0, %s256_s21  ;;  %s91_s26 = scalar_lea.vmem [#allocation2], %s245_s22 }
  0x13   : > { %s99_s27 = sshll.u32 %s91_s26, 4  ;;  %p485_p13 = pnand %p270_p10, %p457_p5  ;;  %s489_s27 = int_to_ptr.vmem [resolvable:$true] %s99_s27 }
  0x14   : > { %s88_s29 = scalar_lea.sflag [#allocation3], %s87_s20  ;;  %s308_s30 = scalar_lea.hbm %s481_s25, 256 }
  0x15   : > { %p309_p2 = scmp.ne.s32.totalorder %s481_s25, %s308_s30  ;;  %p310_p3 = pneg %p485_p13 }
  0x16   : > { %s313_s4 = scalar_lea.hbm %s579_s0, 512  ;;  %p314_p5 = scmp.lt.u32.totalorder %s481_s25, %s579_s0 }
  0x17   : > { %p311_p4 = pnand %p310_p3, %p309_p2  ;;  %p315_p8 = scmp.lt.u32.totalorder %s313_s4, %s308_s30 }
  0x18   : > { %p317_p9 = scmp.lt.u32.totalorder %s308_s30, %s481_s25 }
  0x19   : > { %p312_p7 = pneg %p311_p4  ;;  %p316_p10 = por %p315_p8, %p314_p5 }
  0x1b   : > { %p318_p0 = por %p317_p9, %p316_p10 }
  0x1d   : > { %p319_p1 = pnand %p318_p0, %p312_p7 }
  0x1f   : > { %322 = shalt.err (!%p319_p1)
}
  0x20   : > { %s323_s13 = scalar_lea.vmem %s489_s27, 256  ;;  %s406_s14 = smov [#allocation2]  }
  0x21   : > { %p324_p2 = scmp.ne.s32.totalorder %s489_s27, %s323_s13  ;;  %s328_s16 = sshll.u32 %s406_s14, 4  ;;  %s329_s16 = int_to_ptr.vmem [resolvable:$false] %s328_s16 }
  0x22   : > { %s330_s20 = scalar_lea.vmem %s329_s16, 512  ;;  %p331_p11 = scmp.lt.s32.totalorder %s489_s27, %s329_s16 }
  0x23   : > { %p326_p4 = pnand %p324_p2, %p310_p3  ;;  %p332_p5 = scmp.lt.s32.totalorder %s330_s20, %s323_s13 }
  0x25   : > { %p327_p12 = pneg %p326_p4  ;;  %p333_p8 = por %p332_p5, %p331_p11 }
  0x27   : > { %p334_p9 = pnand %p333_p8, %p327_p12 }
  0x29   : > { %337 = shalt.err (!%p334_p9)
}
  0x2a   : > { %265 = dma.hbm_to_vmem [thread:$0]  (!%p485_p13), %s481_s25, 256, %s489_s27, %s88_s29  }
  0x2b   : > { %p587_p0 = scmp.lt.s32.totalorder %s404_s9, 3  ;;  %p588_p1 = scmp.ge.s32.totalorder %s404_s9, 1 }
  0x2d   : > { %p105_p3 = pnand %p588_p1, %p587_p0 }
  0x2e   : > { %s523_s21 = sand.u32 (!%p105_p3), 1, %s396_s7  }
  0x2f   : > { %108 = sbr.rel (%p105_p3) target bundleno = 100 (0x64), region = 24  ;;  %s249_s22 = sshll.u32 (!%p105_p3), %s523_s21, 4 }
  0x30   : > { %s111_s23 = scalar_lea.sflag (!%p105_p3), [#allocation3], %s523_s21  ;;  %s114_s24 = scalar_lea.vmem (!%p105_p3), [#allocation2], %s249_s22 }
  0x36   : > { %383 = dma.done.wait (%p461_p6), %s111_s23, 256  }
  0x37   : > { %385 = vsyncadd (%p461_p6), %s111_s23, 4294967040  ;;  %v133_v0 = vld [vmem:[%s114_s24] sm:$0xff]  ;;  %v134_v1 = vld [vmem:[%s114_s24 + $0x8] sm:$0xff]  ;;  %s132_s17 = scalar_lea.vmem [#allocation5], %s249_s22  ;;  %s257_s26 = sshll.u32 %s439_s10, 8 }
  0x38   : > { %v135_v2 = vmul.f32 %v133_v0, %v133_v0  ;;  %v136_v3 = vmul.f32 %v134_v1, %v134_v1  ;;  %s172_s25 = sshll.u32 %s132_s17, 4  ;;  %s537_s29 = scalar_lea.hbm %s580_s1, %s257_s26  ;;  %s532_s25 = int_to_ptr.vmem [resolvable:$true] %s172_s25 }
  0x39   : > { %s158_s30 = scalar_lea.sflag [#allocation4], %s523_s21  ;;  %s338_s2 = scalar_lea.vmem %s532_s25, 256 }
  0x3a   : > { %v137_v4 = vmul.f32 %v135_v2, %v133_v0  ;;  %v138_v5 = vmul.f32 %v136_v3, %v134_v1  ;;  %p339_p6 = scmp.ne.s32.totalorder %s532_s25, %s338_s2  ;;  %p589_p11 = scmp.ne.s32.totalorder %s584_s18, 0 }
  0x3b   : > { %s407_s10 = smov [#allocation5]  }
  0x3c   : > { %v139_v6 = vmul.f32 0.044715, %v137_v4  ;;  %v140_v7 = vmul.f32 0.044715, %v138_v5  ;;  %p340_p12 = pnand %p339_p6, %p589_p11  ;;  %s342_s3 = sshll.u32 %s407_s10, 4  ;;  %s343_s3 = int_to_ptr.vmem [resolvable:$false] %s342_s3 }
  0x3d   : > { %s344_s4 = scalar_lea.vmem %s343_s3, 512  ;;  %p345_p7 = scmp.lt.s32.totalorder %s532_s25, %s343_s3 }
  0x3e   : > { %v141_v8 = vadd.f32 %v139_v6, %v133_v0  ;;  %v142_v9 = vadd.f32 %v140_v7, %v134_v1  ;;  %p341_p13 = pneg %p340_p12  ;;  %p346_p10 = scmp.lt.s32.totalorder %s344_s4, %s338_s2 }
  0x40   : > { %v143_v10 = vmul.f32 0.7978846, %v141_v8  ;;  %v144_v11 = vmul.f32 0.7978846, %v142_v9  ;;  %p347_p2 = por %p346_p10, %p345_p7 }
  0x42   : > { %304 = vtanh.f32 %v143_v10  ;;  %p348_p4 = pnand %p347_p2, %p341_p13 }
  0x43   : > { %306 = vtanh.f32 %v144_v11 }
  0x4c   : > { %v305_v12 = vpop.eup %304 }
  0x4d   : > { %v307_v13 = vpop.eup %306  ;;  %v147_v14 = vadd.f32 1.0, %v305_v12 }
  0x4e   : > { %v148_v15 = vadd.f32 1.0, %v307_v13 }
  0x4f   : > { %v149_v16 = vmul.f32 0.5, %v147_v14 }
  0x50   : > { %v150_v17 = vmul.f32 0.5, %v148_v15 }
  0x51   : > { %v151_v18 = vmul.f32 %v149_v16, %v133_v0 }
  0x52   : > { %v152_v19 = vmul.f32 %v150_v17, %v134_v1 }
  0x53   : > { %v153_v20 = vmul.f32 0.5, %v151_v18 }
  0x54   : > { %v154_v21 = vmul.f32 0.5, %v152_v19 }
  0x55   : > { %155 = vst [vmem:[%s132_s17] sm:$0xff] %v153_v20 }
  0x56   : > { %156 = vst [vmem:[%s132_s17 + $0x8] sm:$0xff] %v154_v21 }
  0x57   : > { %351 = shalt.err (!%p348_p4)
}
  0x58   : > { %s352_s5 = scalar_lea.hbm %s537_s29, 256  ;;  %s356_s14 = scalar_lea.hbm %s580_s1, 512 }
  0x59   : > { %p353_p5 = scmp.ne.s32.totalorder %s537_s29, %s352_s5  ;;  %p357_p0 = scmp.lt.u32.totalorder %s537_s29, %s580_s1 }
  0x5a   : > { %p358_p1 = scmp.lt.u32.totalorder %s356_s14, %s352_s5  ;;  %p360_p6 = scmp.lt.u32.totalorder %s352_s5, %s537_s29 }
  0x5b   : > { %p354_p8 = pnand %p353_p5, %p589_p11 }
  0x5c   : > { %p359_p3 = por %p358_p1, %p357_p0 }
  0x5d   : > { %p355_p9 = pneg %p354_p8 }
  0x5e   : > { %p361_p12 = por %p360_p6, %p359_p3 }
  0x60   : > { %p362_p13 = pnand %p361_p12, %p355_p9 }
  0x62   : > { %365 = shalt.err (!%p362_p13)
}
  0x63   : > { %260 = dma.vmem_to_hbm [thread:$0]  (%p589_p11), %s532_s25, 256, %s537_s29, %s158_s30  }
  0x64 PF: > { %s184_s21 = sand.u32 1, %s392_s6   ;;  %p590_p7 = scmp.ne.s32.totalorder %s585_s19, 0 }
  0x65   : > { %p591_p10 = scmp.ge.s32.totalorder %s404_s9, 2  ;;  %s185_s22 = scalar_lea.sflag [#allocation4], %s184_s21 }
  0x67   : > { %p267_p2 = pnand %p591_p10, %p590_p7 }
  0x69   : > { %387 = dma.done.wait (!%p267_p2), %s185_s22, 256  }
  0x6a   : > { %389 = vsyncadd (!%p267_p2), %s185_s22, 4294967040  ;;  %p14_p4 = scmp.ge.s32.totalorder %s443_s12, 4   ;;  %s592_s6 = smov %s396_s7 }
  0x6b   : > { %s593_s7 = smov %s400_s8  ;;  %s594_s8 = smov %s455_s15 }
  0x6c   : > { %s595_s9 = smov %s443_s12  ;;  %16 = sbr.rel (!%p14_p4) target bundleno = 5 (0x5), region = 69 }
  0x73   :  { %190 = vsyncpa [#allocation3], 1 }
  0x74   :  { %192 = vsyncpa [#allocation3 + $0x1], 1 }
  0x75   :  { %193 = vsyncpa [#allocation4], 1 }
  0x76   :  { %195 = vsyncpa [#allocation4 + $0x1], 1 }

</bundles_post_ra>
